<compile_context>
chip_gen: v5e
topology: v5e:2x2
jax: 0.10.0
libtpu: 0.0.40
codegen_flags: <defaults>
</compile_context>

<pallas_src>
import jax
import jax.numpy as jnp
from jax.experimental import pallas as pl
from jax.experimental.pallas import tpu as pltpu


# ---------------------------------------------------------------------------
# Kernels
# ---------------------------------------------------------------------------
def _simple_gate_whole_kernel(x_ref, o_ref):
    # x_ref: (N, 2, Ch, HW) whole-array VMEM block; o_ref: (N, Ch, HW).
    o_ref[...] = x_ref[:, 0, :, :] * x_ref[:, 1, :, :]


def _simple_gate_tiled_kernel(x1_ref, x2_ref, o_ref):
    # x1_ref / x2_ref / o_ref: (1, TC, THW) lane-dense VMEM tiles.
    o_ref[...] = x1_ref[...] * x2_ref[...]


# ---------------------------------------------------------------------------
# Tile selection (tiled path only)
# ---------------------------------------------------------------------------
def _pick_tiles(ch, hw, itemsize, target_bytes=1 << 20):
    """~target_bytes per input tile; lane dim a 128-multiple (or full extent),
    sublane dim a dtype-packing multiple (8 f32 / 16 bf16 / 32 i8) or full."""
    if hw * itemsize > target_bytes:
        thw = min(hw, max(128, (target_bytes // itemsize) // 128 * 128))
    else:
        thw = hw
    sub = max(1, 32 // itemsize)
    tc = min(ch, max(1, target_bytes // max(1, thw * itemsize)))
    tc = ch if ch <= sub else max(sub, (tc // sub) * sub)
    return tc, thw


# ---------------------------------------------------------------------------
# Wrapper
# ---------------------------------------------------------------------------
_SMALL_BYTES = 4 * 1024 * 1024  # single-block path: <= ~6 MiB resident in VMEM


@jax.jit
def simple_gate(x):
    """SimpleGate with dim=1 (channel split) on an NCHW input."""
    N, C, H, W = x.shape
    assert C % 2 == 0, "channel dim must be even to chunk in 2"
    ch = C // 2
    hw = H * W
    itemsize = x.dtype.itemsize

    # Free reshape (contiguous NCHW): channel halves -> dedicated axis of 2,
    # spatial dims -> one lane-dense trailing axis.
    xr = x.reshape(N, 2, ch, hw)

    if N * C * hw * itemsize <= _SMALL_BYTES:
        # One DMA in, one DMA out; split + multiply inside the kernel.
        out = pl.pallas_call(
            _simple_gate_whole_kernel,
            out_shape=jax.ShapeDtypeStruct((N, ch, hw), x.dtype),
            in_specs=[pl.BlockSpec(memory_space=pltpu.MemorySpace.VMEM)],
            out_specs=pl.BlockSpec(memory_space=pltpu.MemorySpace.VMEM),
        )(xr)
    else:
        tc, thw = _pick_tiles(ch, hw, itemsize)
        grid = (N, pl.cdiv(ch, tc), pl.cdiv(hw, thw))
        out = pl.pallas_call(
            _simple_gate_tiled_kernel,
            out_shape=jax.ShapeDtypeStruct((N, ch, hw), x.dtype),
            grid=grid,
            in_specs=[
                # first channel half (half-axis block index 0, squeezed)
                pl.BlockSpec((1, None, tc, thw), lambda n, c, w: (n, 0, c, w)),
                # second channel half (half-axis block index 1, squeezed)
                pl.BlockSpec((1, None, tc, thw), lambda n, c, w: (n, 1, c, w)),
            ],
            out_specs=pl.BlockSpec((1, tc, thw), lambda n, c, w: (n, c, w)),
            compiler_params=pltpu.CompilerParams(
                # Pure elementwise: every grid axis is independent, so let the
                # runtime shard across megacore / v7x's two TensorCores.
                dimension_semantics=("parallel", "parallel", "parallel"),
                # 2 inputs + 1 output, double-buffered, ~1 MiB tiles ~= 6 MiB;
                # 32 MiB is generous headroom yet fits v7x's 64 MiB VMEM.
                vmem_limit_bytes=32 * 1024 * 1024,
            ),
        )(xr, xr)  # same array twice; the two specs window different halves

    return out.reshape(N, ch, H, W)


def _reference(x):
    x1, x2 = jnp.split(x, 2, axis=1)
    return x1 * x2


if __name__ == "__main__":
    key = jax.random.PRNGKey(0)
    k_small, k_large = jax.random.split(key)

    # Primary (small) case: matches the PyTorch module's typical NCHW use.
    N, C, H, W = 2, 4, 16, 16
    x = jax.random.normal(k_small, (N, C, H, W), dtype=jnp.float32)
    out = jax.block_until_ready(simple_gate(x))
    assert out.shape == (N, C // 2, H, W)
    assert jnp.allclose(out, _reference(x), atol=1e-6, rtol=1e-6)

    # Secondary case: big enough (8 MiB) to exercise the tiled / gridded path.
    N2, C2, H2, W2 = 1, 128, 128, 128
    x_big = jax.random.normal(k_large, (N2, C2, H2, W2), dtype=jnp.float32)
    out_big = jax.block_until_ready(simple_gate(x_big))
    assert out_big.shape == (N2, C2 // 2, H2, W2)
    assert jnp.allclose(out_big, _reference(x_big), atol=1e-6, rtol=1e-6)

    print("KERNEL_OK")
</pallas_src>

<mosaic_0001>
module attributes {stable_mosaic.version = 11 : i64} {
  func.func @_simple_gate_whole_kernel(%arg0: memref<2x2x2x256xf32, #tpu.memory_space<vmem>>, %arg1: memref<2x2x256xf32, #tpu.memory_space<vmem>>) attributes {dimension_semantics = [], scalar_prefetch = 0 : i64, scratch_operands = 0 : i64, tpu.core_type = #tpu.core_type<tc>} {
    %c0 = arith.constant 0 : index
    %c0_0 = arith.constant 0 : index
    %c0_1 = arith.constant 0 : index
    %c0_2 = arith.constant 0 : index
    %0 = vector.load %arg0[%c0, %c0_0, %c0_1, %c0_2] : memref<2x2x2x256xf32, #tpu.memory_space<vmem>>, vector<2x1x2x256xf32>
    %1 = vector.shape_cast %0 : vector<2x1x2x256xf32> to vector<2x2x256xf32>
    %c0_3 = arith.constant 0 : index
    %c1 = arith.constant 1 : index
    %c0_4 = arith.constant 0 : index
    %c0_5 = arith.constant 0 : index
    %2 = vector.load %arg0[%c0_3, %c1, %c0_4, %c0_5] : memref<2x2x2x256xf32, #tpu.memory_space<vmem>>, vector<2x1x2x256xf32>
    %3 = vector.shape_cast %2 : vector<2x1x2x256xf32> to vector<2x2x256xf32>
    %4 = arith.mulf %1, %3 : vector<2x2x256xf32>
    %c0_6 = arith.constant 0 : index
    %c0_7 = arith.constant 0 : index
    %c0_8 = arith.constant 0 : index
    %5 = vector.load %arg1[%c0_6, %c0_7, %c0_8] : memref<2x2x256xf32, #tpu.memory_space<vmem>>, vector<2x2x256xf32>
    tpu.vector_store %arg1[%c0_6, %c0_7, %c0_8], %4 {strides = array<i32>} : memref<2x2x256xf32, #tpu.memory_space<vmem>>, vector<2x2x256xf32>,
    return
  }
}

</mosaic_0001>

<bundles_post_ra>
// kernel: simple_gate.1
= control target key start
LH: loop header
LB: loop body
LE: loop exit
PB: predicated region body
PF: predicated region fallthrough
CT: control target
= control target key end

     0   :  { %s51_s0 = inlined_call_operand.vmem [shape: f32[2,2,2,256], index: 0, kind: input, shape index: {}]   ;;  %s52_s1 = inlined_call_operand.vmem [shape: f32[2,2,256], index: 1, kind: output, shape index: {}]  }
   0x1   :  { %v8_v0 = vld [vmem:[%s51_s0] sm:$0xf]  ;;  %v21_v1 = vld [vmem:[%s51_s0 + $0x4] sm:$0xf]  ;;  %v9_v2 = vld [vmem:[%s51_s0 + $0x8] sm:$0xf] }
   0x2   :  { %v13_v3 = vmul.f32 %v21_v1, %v8_v0  ;;  %v22_v4 = vld [vmem:[%s51_s0 + $0xc] sm:$0xf] }
   0x3   :  { %v14_v5 = vmul.f32 %v22_v4, %v9_v2 }
   0x4   :  { %15 = vst [vmem:[%s52_s1] sm:$0xf] %v13_v3 }
   0x5   :  { %16 = vst [vmem:[%s52_s1 + $0x4] sm:$0xf] %v14_v5 }

</bundles_post_ra>
